<compile_context>
chip_gen: v6e
topology: v6e:2x2x1
jax: 0.10.0
libtpu: 0.0.40
codegen_flags: <defaults>
</compile_context>

<pallas_src>
import functools

import jax
import jax.numpy as jnp
from jax.experimental import pallas as pl
from jax.experimental.pallas import tpu as pltpu


def _round_up(a: int, m: int) -> int:
    return ((a + m - 1) // m) * m


def liquid_cell_kernel(x_ref, w_ref, b_ref, inv_tau_ref, om_inv_tau_ref,
                       h_ref, out_ref):
    # x:  [TB, I]   w: [I, TH]   b/inv_tau/om_inv_tau: [1, TH]   h: [TB, TH]
    # MXU matmul in native input dtype with f32 accumulation.
    mm = jnp.dot(x_ref[...], w_ref[...], preferred_element_type=jnp.float32)
    act = jnp.tanh(mm + b_ref[...])                      # EUP tanh, f32
    h_prev = h_ref[...].astype(jnp.float32)
    # h_new = h_prev * (1 - 1/tau) + tanh(xW + b) * (1/tau)   (VPU only)
    out_ref[...] = (h_prev * om_inv_tau_ref[...]
                    + act * inv_tau_ref[...]).astype(out_ref.dtype)


def liquid_time_cell(x, input_weights, input_bias, tau, h_prev=None):
    """Pallas-backed forward of LiquidTimeCell.

    x:             [B, input_size]
    input_weights: [input_size, hidden_size]
    input_bias:    [hidden_size]
    tau:           [hidden_size]
    h_prev:        [B, hidden_size] or None
    returns h_new: [B, hidden_size]
    """
    B, I = x.shape
    H = input_weights.shape[1]
    if h_prev is None:
        h_prev = jnp.zeros((B, H), dtype=x.dtype)

    # ---- tile sizes / padded shapes -------------------------------------
    # Batch tile: multiple of 8 sublanes, capped at 128 rows per tile.
    if B <= 128:
        TB = _round_up(B, 8)
        B_pad = TB
    else:
        TB = 128
        B_pad = _round_up(B, TB)
    # Hidden tile: lane-dense (multiple of 128), capped at 512 lanes per tile.
    if H <= 512:
        TH = _round_up(H, 128)
        H_pad = TH
    else:
        TH = 512
        H_pad = _round_up(H, TH)

    # ---- pad operands (zeros everywhere, ones for tau so 1/tau is finite) --
    x_p = jnp.zeros((B_pad, I), x.dtype).at[:B, :].set(x)
    w_p = jnp.zeros((I, H_pad), input_weights.dtype).at[:, :H].set(input_weights)
    h_p = jnp.zeros((B_pad, H_pad), h_prev.dtype).at[:B, :H].set(h_prev)

    b_p = jnp.zeros((1, H_pad), jnp.float32).at[0, :H].set(
        input_bias.astype(jnp.float32))
    tau_p = jnp.ones((1, H_pad), jnp.float32).at[0, :H].set(
        tau.astype(jnp.float32))
    inv_tau = 1.0 / tau_p                    # precomputed: no division in-kernel
    om_inv_tau = 1.0 - inv_tau               # (1 - 1/tau)

    grid = (B_pad // TB, H_pad // TH)

    out_p = pl.pallas_call(
        liquid_cell_kernel,
        out_shape=jax.ShapeDtypeStruct((B_pad, H_pad), x.dtype),
        grid_spec=pltpu.PrefetchScalarGridSpec(
            num_scalar_prefetch=0,
            grid=grid,
            in_specs=[
                pl.BlockSpec((TB, I), lambda i, j: (i, 0)),   # x
                pl.BlockSpec((I, TH), lambda i, j: (0, j)),   # W
                pl.BlockSpec((1, TH), lambda i, j: (0, j)),   # bias
                pl.BlockSpec((1, TH), lambda i, j: (0, j)),   # 1/tau
                pl.BlockSpec((1, TH), lambda i, j: (0, j)),   # 1 - 1/tau
                pl.BlockSpec((TB, TH), lambda i, j: (i, j)),  # h_prev
            ],
            out_specs=pl.BlockSpec((TB, TH), lambda i, j: (i, j)),
        ),
        compiler_params=pltpu.CompilerParams(
            dimension_semantics=("parallel", "parallel")),
    )(x_p, w_p, b_p, inv_tau, om_inv_tau, h_p)

    return out_p[:B, :H]


def liquid_time_cell_ref(x, input_weights, input_bias, tau, h_prev=None):
    """Pure-JAX reference (mirrors the PyTorch forward exactly)."""
    B = x.shape[0]
    H = input_weights.shape[1]
    if h_prev is None:
        h_prev = jnp.zeros((B, H), dtype=x.dtype)
    input_contrib = x @ input_weights + input_bias
    dh = (-h_prev + jnp.tanh(input_contrib)) / tau[None, :]
    return h_prev + dh


if __name__ == "__main__":
    key = jax.random.PRNGKey(0)
    k_w, k_x, k_h = jax.random.split(key, 3)

    batch = 8
    input_size = 16
    hidden_size = 32

    # Deterministic parameter init mirroring the PyTorch __init__:
    #   input_weights = randn(I, H) * 0.01 ; input_bias = zeros(H)
    #   tau = ones(H) * 0.5 + 0.1
    input_weights = jax.random.normal(
        k_w, (input_size, hidden_size), jnp.float32) * 0.01
    input_bias = jnp.zeros((hidden_size,), jnp.float32)
    tau = jnp.ones((hidden_size,), jnp.float32) * 0.5 + 0.1

    x = jax.random.normal(k_x, (batch, input_size), jnp.float32)
    h_prev = jax.random.normal(k_h, (batch, hidden_size), jnp.float32)

    # Run with and without an explicit previous hidden state.
    h_new = liquid_time_cell(x, input_weights, input_bias, tau, h_prev)
    h_new0 = liquid_time_cell(x, input_weights, input_bias, tau, None)
    jax.block_until_ready((h_new, h_new0))

    # Correctness check against the pure-JAX reference.
    ref = liquid_time_cell_ref(x, input_weights, input_bias, tau, h_prev)
    ref0 = liquid_time_cell_ref(x, input_weights, input_bias, tau, None)
    assert h_new.shape == (batch, hidden_size)
    assert jnp.allclose(h_new, ref, atol=1e-5, rtol=1e-5)
    assert jnp.allclose(h_new0, ref0, atol=1e-5, rtol=1e-5)

    print("KERNEL_OK")
</pallas_src>

<mosaic_0001>
module attributes {stable_mosaic.version = 11 : i64} {
  func.func @liquid_cell_kernel(%arg0: i32, %arg1: i32, %arg2: memref<8x16xf32, #tpu.memory_space<vmem>>, %arg3: memref<16x128xf32, #tpu.memory_space<vmem>>, %arg4: memref<1x128xf32, #tpu.memory_space<vmem>>, %arg5: memref<1x128xf32, #tpu.memory_space<vmem>>, %arg6: memref<1x128xf32, #tpu.memory_space<vmem>>, %arg7: memref<8x128xf32, #tpu.memory_space<vmem>>, %arg8: memref<8x128xf32, #tpu.memory_space<vmem>>) attributes {dimension_semantics = [#tpu.dimension_semantics<parallel>, #tpu.dimension_semantics<parallel>], iteration_bounds = array<i64: 1, 1>, scalar_prefetch = 0 : i64, scratch_operands = 0 : i64, tpu.core_type = #tpu.core_type<tc>, window_params = [{transform_indices = @transform_0, window_bounds = array<i64: 8, 16>}, {transform_indices = @transform_1, window_bounds = array<i64: 16, 128>}, {transform_indices = @transform_2, window_bounds = array<i64: 1, 128>}, {transform_indices = @transform_3, window_bounds = array<i64: 1, 128>}, {transform_indices = @transform_4, window_bounds = array<i64: 1, 128>}, {transform_indices = @transform_5, window_bounds = array<i64: 8, 128>}, {transform_indices = @transform_6, window_bounds = array<i64: 8, 128>}]} {
    %c0 = arith.constant 0 : index
    %c0_0 = arith.constant 0 : index
    %0 = vector.load %arg2[%c0, %c0_0] : memref<8x16xf32, #tpu.memory_space<vmem>>, vector<8x16xf32>
    %c0_1 = arith.constant 0 : index
    %c0_2 = arith.constant 0 : index
    %1 = vector.load %arg3[%c0_1, %c0_2] : memref<16x128xf32, #tpu.memory_space<vmem>>, vector<16x128xf32>
    %cst = arith.constant dense<0.000000e+00> : vector<8x128xf32>
    %2 = tpu.matmul %0, %1, %cst {dimension_numbers = #tpu.dot_dimension_numbers<[1], [0], [0], [1], [0, 0, 1, 1], [], []>} : vector<8x16xf32>, vector<16x128xf32>, vector<8x128xf32> -> vector<8x128xf32>
    %c0_3 = arith.constant 0 : index
    %c0_4 = arith.constant 0 : index
    %3 = vector.load %arg4[%c0_3, %c0_4] : memref<1x128xf32, #tpu.memory_space<vmem>>, vector<1x128xf32>
    %4 = vector.broadcast %3 : vector<1x128xf32> to vector<8x128xf32>
    %5 = arith.addf %2, %4 : vector<8x128xf32>
    %6 = math.tanh %5 : vector<8x128xf32>
    %c0_5 = arith.constant 0 : index
    %c0_6 = arith.constant 0 : index
    %7 = vector.load %arg7[%c0_5, %c0_6] : memref<8x128xf32, #tpu.memory_space<vmem>>, vector<8x128xf32>
    %c0_7 = arith.constant 0 : index
    %c0_8 = arith.constant 0 : index
    %8 = vector.load %arg6[%c0_7, %c0_8] : memref<1x128xf32, #tpu.memory_space<vmem>>, vector<1x128xf32>
    %9 = vector.broadcast %8 : vector<1x128xf32> to vector<8x128xf32>
    %10 = arith.mulf %7, %9 : vector<8x128xf32>
    %c0_9 = arith.constant 0 : index
    %c0_10 = arith.constant 0 : index
    %11 = vector.load %arg5[%c0_9, %c0_10] : memref<1x128xf32, #tpu.memory_space<vmem>>, vector<1x128xf32>
    %12 = vector.broadcast %11 : vector<1x128xf32> to vector<8x128xf32>
    %13 = arith.mulf %6, %12 : vector<8x128xf32>
    %14 = arith.addf %10, %13 : vector<8x128xf32>
    %c0_11 = arith.constant 0 : index
    %c0_12 = arith.constant 0 : index
    %15 = vector.load %arg8[%c0_11, %c0_12] : memref<8x128xf32, #tpu.memory_space<vmem>>, vector<8x128xf32>
    tpu.vector_store %arg8[%c0_11, %c0_12], %14 {strides = array<i32>} : memref<8x128xf32, #tpu.memory_space<vmem>>, vector<8x128xf32>,
    return
  }
  func.func @transform_0(%arg0: i32, %arg1: i32) -> (i32, i32) {
    %c0_i32 = arith.constant 0 : i32
    %c0_i32_0 = arith.constant 0 : i32
    return %arg0, %c0_i32 : i32, i32
  }
  func.func @transform_1(%arg0: i32, %arg1: i32) -> (i32, i32) {
    %c0_i32 = arith.constant 0 : i32
    %c0_i32_0 = arith.constant 0 : i32
    return %c0_i32, %arg1 : i32, i32
  }
  func.func @transform_2(%arg0: i32, %arg1: i32) -> (i32, i32) {
    %c0_i32 = arith.constant 0 : i32
    %c0_i32_0 = arith.constant 0 : i32
    return %c0_i32, %arg1 : i32, i32
  }
  func.func @transform_3(%arg0: i32, %arg1: i32) -> (i32, i32) {
    %c0_i32 = arith.constant 0 : i32
    %c0_i32_0 = arith.constant 0 : i32
    return %c0_i32, %arg1 : i32, i32
  }
  func.func @transform_4(%arg0: i32, %arg1: i32) -> (i32, i32) {
    %c0_i32 = arith.constant 0 : i32
    %c0_i32_0 = arith.constant 0 : i32
    return %c0_i32, %arg1 : i32, i32
  }
  func.func @transform_5(%arg0: i32, %arg1: i32) -> (i32, i32) {
    %c0_i32 = arith.constant 0 : i32
    return %arg0, %arg1 : i32, i32
  }
  func.func @transform_6(%arg0: i32, %arg1: i32) -> (i32, i32) {
    %c0_i32 = arith.constant 0 : i32
    return %arg0, %arg1 : i32, i32
  }
}

</mosaic_0001>

<bundles_post_ra>
// kernel: tpu_custom_call.1
= control target key start
LH: loop header
LB: loop body
LE: loop exit
PB: predicated region body
PF: predicated region fallthrough
CT: control target
= control target key end

     0   :  { %11 = vsyncpa [#allocation3], 0  ;;  %s392_s0 = inlined_call_operand.hbm [shape: f32[8,16], index: 0, kind: input, shape index: {}]   ;;  %s393_s1 = inlined_call_operand.hbm [shape: f32[16,128], index: 1, kind: input, shape index: {}]   ;;  %s394_s2 = inlined_call_operand.vmem [shape: f32[1,128], index: 2, kind: input, shape index: {}]   ;;  %s395_s3 = inlined_call_operand.hbm [shape: f32[1,128], index: 3, kind: input, shape index: {}]   ;;  %s396_s4 = inlined_call_operand.hbm [shape: f32[1,128], index: 4, kind: input, shape index: {}]   ;;  %s397_s5 = inlined_call_operand.vmem [shape: f32[8,128], index: 5, kind: input, shape index: {}]   ;;  %s398_s6 = inlined_call_operand.hbm [shape: f32[8,128], index: 6, kind: output, shape index: {}]  }
   0x1   :  { %12 = vsyncpa [#allocation6], 0 }
   0x2   :  { %13 = vsyncpa [#allocation9], 0 }
   0x3   :  { %14 = vsyncpa [#allocation4], 0  ;;  %s327_s21 = smov [#allocation5]  }
   0x4   :  { %s30_s22 = sshll.u32 %s327_s21, 4  ;;  %s31_s22 = int_to_ptr.vmem [resolvable:$true] %s30_s22 }
   0x5   :  { %s227_s23 = scalar_lea.vmem %s31_s22, 256  ;;  %p232_p1 = scmp.lt.s32.totalorder %s31_s22, %s31_s22 }
   0x6   :  { %p228_p0 = scmp.ne.s32.totalorder %s31_s22, %s227_s23  ;;  %p233_p2 = scmp.lt.s32.totalorder %s227_s23, %s227_s23 }
   0x8   :  { %p234_p3 = por %p233_p2, %p232_p1 }
   0xa   :  { %p235_p4 = pnand %p234_p3, %p228_p0 }
   0xc   :  { %238 = shalt.err (!%p235_p4)
}
   0xd   :  { %s328_s24 = smov 128   ;;  %s329_s25 = smov 8  }
   0xe   :  { %36 = dma.hbm_to_vmem [thread:$0]  %s393_s1, 256, %s31_s22, [#allocation6], %s328_s24, %s328_s24, %s329_s25  }
   0xf   :  { %s330_s28 = smov [#allocation2]   ;;  %s331_s30 = smov [#allocation7]  }
  0x10   :  { %s21_s29 = sshll.u32 %s330_s28, 4  ;;  %s45_s7 = sshll.u32 %s331_s30, 4  ;;  %s22_s29 = int_to_ptr.vmem [resolvable:$true] %s21_s29  ;;  %s46_s7 = int_to_ptr.vmem [resolvable:$true] %s45_s7 }
  0x11   :  { %s247_s8 = scalar_lea.vmem %s22_s29, 128  ;;  %p252_p6 = scmp.lt.s32.totalorder %s22_s29, %s22_s29 }
  0x12   :  { %p248_p5 = scmp.ne.s32.totalorder %s22_s29, %s247_s8  ;;  %p253_p7 = scmp.lt.s32.totalorder %s247_s8, %s247_s8 }
  0x14   :  { %p254_p8 = por %p253_p7, %p252_p6 }
  0x16   :  { %p255_p9 = pnand %p254_p8, %p248_p5 }
  0x18   :  { %258 = shalt.err (!%p255_p9)
}
  0x19   :  { %24 = dma.hbm_to_vmem [thread:$0]  %s392_s0, 128, %s22_s29, [#allocation3]  }
  0x1a   :  { %s267_s11 = scalar_lea.vmem %s46_s7, 16  ;;  %s271_s1 = scalar_lea.vmem %s46_s7, 32 }
  0x1b   :  { %p268_p10 = scmp.ne.s32.totalorder %s46_s7, %s267_s11  ;;  %p272_p11 = scmp.lt.s32.totalorder %s46_s7, %s46_s7 }
  0x1c   :  { %p273_p12 = scmp.lt.s32.totalorder %s271_s1, %s267_s11 }
  0x1e   :  { %p274_p13 = por %p273_p12, %p272_p11 }
  0x20   :  { %p275_p0 = pnand %p274_p13, %p268_p10 }
  0x22   :  { %278 = shalt.err (!%p275_p0)
}
  0x23   :  { %48 = dma.hbm_to_vmem [thread:$0]  %s395_s3, 16, %s46_s7, [#allocation6]  }
  0x24   :  { %s332_s14 = smov [#allocation8]  }
  0x25   :  { %s55_s15 = sshll.u32 %s332_s14, 4  ;;  %s56_s15 = int_to_ptr.vmem [resolvable:$true] %s55_s15 }
  0x26   :  { %s287_s16 = scalar_lea.vmem %s56_s15, 16  ;;  %s291_s17 = scalar_lea.vmem %s56_s15, 32 }
  0x27   :  { %p288_p1 = scmp.ne.s32.totalorder %s56_s15, %s287_s16  ;;  %p292_p2 = scmp.lt.s32.totalorder %s56_s15, %s56_s15 }
  0x28   :  { %p293_p3 = scmp.lt.s32.totalorder %s291_s17, %s287_s16 }
  0x2a   :  { %p294_p4 = por %p293_p3, %p292_p2 }
  0x2c   :  { %p295_p5 = pnand %p294_p4, %p288_p1 }
  0x2e   :  { %298 = shalt.err (!%p295_p5)
}
  0x2f   :  { %58 = dma.hbm_to_vmem [thread:$0]  %s396_s4, 16, %s56_s15, [#allocation9]  }
  0x30   :  { %319 = dma.done.wait [#allocation3], 128  }
  0x31   :  { %320 = vsyncadd [#allocation3], 4294967168 }
  0x32   :  { %321 = dma.done.wait [#allocation6], 272  }
  0x33   :  { %322 = vsyncadd [#allocation6], 4294967024 }
  0x34   :  { %323 = dma.done.wait [#allocation9], 16  }
  0x35   :  { %324 = vsyncadd [#allocation9], 4294967280  ;;  %v333_v0 = vmov 0.0   ;;  %vm334_vm0 = vmmov 0   ;;  %v75_v1 = vld [vmem:[#allocation5 + $0x8] sm:$0xff]  ;;  %v74_v2 = vld [vmem:[#allocation5] sm:$0xff] }
  0x36   :  { %201 = vmatprep.subr.mxu0 %v333_v0  ;;  %205 = vmatprep.mubr.msk.f32.mxu0 %vm334_vm0, %v333_v0  ;;  %v73_v3 = vld [vmem:[#allocation2] sm:$0xff]  ;;  %vm83_vm1 = vcmask 130048   ;;  %v196_v9 = vld [vmem:[#allocation8] ss:$0 sm:$0xff]  ;;  %v197_v10 = vld [vmem:[#allocation7] ss:$0 sm:$0xff] }
  0x37   :  { %202 = vmatpush3.msra.mxu0 %v75_v1  ;;  %v194_v4 = vld [vmem:[%s394_s2] ss:$0 sm:$0xff]  ;;  %s335_s21 = smov [#allocation10]  }
  0x38   :  { %203 = vmatprep.subr.mxu0 %v333_v0  ;;  %v158_v8 = vld [vmem:[%s397_s5] sm:$0xff]  ;;  %s183_s22 = sshll.u32 %s335_s21, 4  ;;  %s184_s22 = int_to_ptr.vmem [resolvable:$true] %s183_s22 }
  0x39   :  { %204 = vmatpush3.msra.mxu0 %v74_v2  ;;  %v166_v11 = vmul.f32 %v196_v9, %v158_v8  ;;  %s299_s23 = scalar_lea.vmem %s184_s22, 128  ;;  %p304_p7 = scmp.lt.s32.totalorder %s184_s22, %s184_s22 }
  0x3a   :  { %206 = vmatmul.mubr.msk.f32.vlgmr.msra.gmra.mxu0 %vm83_vm1, %v73_v3  ;;  %p300_p6 = scmp.ne.s32.totalorder %s184_s22, %s299_s23  ;;  %p305_p8 = scmp.lt.s32.totalorder %s299_s23, %s299_s23 }
  0x3c   :  { %p306_p9 = por %p305_p8, %p304_p7 }
  0x3e   :  { %p307_p10 = pnand %p306_p9, %p300_p6 }
  0xfa   :  { %v153_v5 = vpop.f32.mrf.mxu0 }
  0xfb   :  { %v154_v6 = vadd.f32 %v194_v4, %v153_v5 }
  0xfc   :  { %v207_v7 = vpop.f32.mrf.mxu0 }
  0xfd   :  { %217 = vtanh.f32 %v154_v6 }
 0x10a   :  { %v218_v12 = vpop.eup %217 }
 0x10b   :  { %v174_v13 = vmul.f32 %v218_v12, %v197_v10 }
 0x10d   :  { %v175_v14 = vadd.f32 %v174_v13, %v166_v11 }
 0x10f   :  { %176 = vst [vmem:[#allocation10] sm:$0xff] %v175_v14 }
 0x110   :  { %310 = shalt.err (!%p307_p10)
}
 0x111   :  { %186 = dma.vmem_to_hbm [thread:$0]  %s184_s22, 128, %s398_s6, [#allocation4]  }
 0x112   :  { %325 = dma.done.wait [#allocation4], 128  }
 0x113   :  { %326 = vsyncadd [#allocation4], 4294967168 }
 0x114   :  { %190 = vsyncpa [#allocation3], 1 }
 0x115   :  { %191 = vsyncpa [#allocation6], 1 }
 0x116   :  { %192 = vsyncpa [#allocation9], 1 }
 0x117   :  { %193 = vsyncpa [#allocation4], 1 }

</bundles_post_ra>
